<compile_context>
chip_gen: v7x
topology: tpu7x:2x2x1
jax: 0.10.0
libtpu: 0.0.40
codegen_flags: <defaults>
</compile_context>

<pallas_src>
import functools

import jax
import jax.numpy as jnp
from jax.experimental import pallas as pl
from jax.experimental.pallas import tpu as pltpu


def _round_up(x, m):
    return (x + m - 1) // m * m


# ---------------------------------------------------------------------------
# Pallas kernel: one output tile of  y = x @ w + b  (f32 accumulation)
# ---------------------------------------------------------------------------
def _proj_kernel(x_ref, w_ref, b_ref, o_ref):
    # x_ref: (tm, F), w_ref: (F, tn), b_ref: (1, tn) f32, o_ref: (tm, tn)
    acc = jnp.dot(x_ref[...], w_ref[...], preferred_element_type=jnp.float32)
    o_ref[...] = (acc + b_ref[...]).astype(o_ref.dtype)


def _choose_tm(M, F, out_cols, in_itemsize, out_itemsize, reserved_bytes):
    """Pick an M tile under a ~26 MiB VMEM budget (v7x-safe), dtype-aware."""
    # Sublane packing granule: 8 rows for 32-bit, 16 for bf16, 32 for 8-bit.
    granule = 8 if in_itemsize >= 4 else (16 if in_itemsize == 2 else 32)
    budget = 26 * 1024 * 1024 - reserved_bytes
    # Double-buffered x tile + double-buffered output tile per row of tm.
    per_row = 2 * F * in_itemsize + 2 * out_cols * out_itemsize
    tm = max(granule, min(512, budget // per_row))
    # Align to MXU-friendly multiples (256-row passes on v6e/v7x).
    if tm >= 256:
        tm = (tm // 256) * 256
    elif tm >= 128:
        tm = (tm // 128) * 128
    else:
        tm = (tm // granule) * granule
    if M <= tm:
        return _round_up(M, granule)
    # Prefer a tm that divides M exactly (no padded final tile), but never
    # shrink by more than 2x for it.
    cand = tm
    while cand >= max(granule, tm // 2):
        if M % cand == 0:
            return cand
        cand -= granule
    return tm


def _projection(x2d, w, b, out_dtype):
    """x2d: (M, F), w: (F, E), b: (E,) -> (M, E) in out_dtype."""
    M, F = x2d.shape
    E = w.shape[1]
    in_itemsize = jnp.dtype(x2d.dtype).itemsize
    out_itemsize = jnp.dtype(out_dtype).itemsize

    w = w.astype(x2d.dtype)
    b = b.astype(jnp.float32)

    # Resident-weight mode: keep the full (F, E_pad) weight + bias in VMEM for
    # the whole call (no N grid axis; W is DMA'd from HBM exactly once).
    E_pad_resident = _round_up(E, 128)
    resident = F * E_pad_resident * in_itemsize <= 12 * 1024 * 1024
    if resident:
        E_pad = E_pad_resident
        tn = E_pad
        reserved = F * E_pad * in_itemsize + E_pad * 4
    else:
        # Fallback: N-tiled with tn = 256 so the MXU N dimension stays full on
        # v6e/v7x; weight tiles are double-buffered.
        E_pad = _round_up(E, 256)
        tn = 256
        reserved = 2 * F * tn * in_itemsize + tn * 4

    tm = _choose_tm(M, F, tn, in_itemsize, out_itemsize, reserved)
    M_pad = _round_up(M, tm)

    if M_pad != M:
        x2d = jnp.pad(x2d, ((0, M_pad - M), (0, 0)))
    if E_pad != E:
        w = jnp.pad(w, ((0, 0), (0, E_pad - E)))
        b = jnp.pad(b, ((0, E_pad - E),))
    b2d = b.reshape(1, E_pad)

    cost = pl.CostEstimate(
        flops=2 * M_pad * F * E_pad,
        transcendentals=0,
        bytes_accessed=(M_pad * F * in_itemsize + F * E_pad * in_itemsize
                        + E_pad * 4 + M_pad * E_pad * out_itemsize),
    )

    if resident:
        # NOTE: on v7x, M_pad // tm >= 2 keeps both TensorCores busy; for
        # large M the budgeted tm guarantees that automatically.
        grid = (M_pad // tm,)
        in_specs = [
            pl.BlockSpec((tm, F), lambda i: (i, 0)),
            pl.BlockSpec((F, E_pad), lambda i: (0, 0)),   # resident weight
            pl.BlockSpec((1, E_pad), lambda i: (0, 0)),   # resident bias
        ]
        out_specs = pl.BlockSpec((tm, E_pad), lambda i: (i, 0))
        dims = ("parallel",)
    else:
        grid = (M_pad // tm, E_pad // tn)
        in_specs = [
            pl.BlockSpec((tm, F), lambda i, j: (i, 0)),
            pl.BlockSpec((F, tn), lambda i, j: (0, j)),
            pl.BlockSpec((1, tn), lambda i, j: (0, j)),
        ]
        out_specs = pl.BlockSpec((tm, tn), lambda i, j: (i, j))
        dims = ("parallel", "parallel")

    y = pl.pallas_call(
        _proj_kernel,
        out_shape=jax.ShapeDtypeStruct((M_pad, E_pad), out_dtype),
        grid_spec=pltpu.PrefetchScalarGridSpec(
            num_scalar_prefetch=0,
            grid=grid,
            in_specs=in_specs,
            out_specs=out_specs,
        ),
        compiler_params=pltpu.CompilerParams(
            dimension_semantics=dims,
            vmem_limit_bytes=32 * 1024 * 1024,
        ),
        cost_estimate=cost,
    )(x2d, w, b2d)

    if M_pad != M or E_pad != E:
        y = y[:M, :E]
    return y


# ---------------------------------------------------------------------------
# PatchEmbedding forward
# ---------------------------------------------------------------------------
def patch_embedding_forward(x, w, b, *, patch_height, patch_width,
                            compute_dtype=None):
    """
    x: (B, C, H, W), NCHW (same as PyTorch).
    w: (C*ph*pw, embed_dim)  -- stored transposed vs nn.Linear.weight
    b: (embed_dim,)
    compute_dtype: optionally cast x/w (e.g. jnp.bfloat16 — recommended on
        v5e/v6e/v7x to halve HBM traffic of this memory-bound GEMM);
        accumulation stays f32 via preferred_element_type.
    returns: (B, num_patches, embed_dim) in x's original dtype.
    """
    B, C, H, W = x.shape
    ph, pw = patch_height, patch_width
    assert H % ph == 0 and W % pw == 0, "dims must be divisible by patch size"
    nh, nw = H // ph, W // pw
    n = nh * nw
    F = C * ph * pw
    E = w.shape[1]

    out_dtype = x.dtype
    # Cast BEFORE the patch transpose so the (M, F) patch intermediate and the
    # transpose traffic are in the narrow dtype if one is requested.
    if compute_dtype is not None:
        x = x.astype(compute_dtype)
        w = w.astype(compute_dtype)

    # Patch extraction (layout glue; feature order (c, ph, pw) matches the
    # PyTorch unfold + permute + reshape):
    # (B, C, H, W) -> (B, C, nh, ph, nw, pw) -> (B, nh, nw, C, ph, pw)
    # -> (B*n, C*ph*pw)
    patches = x.reshape(B, C, nh, ph, nw, pw)
    patches = jnp.transpose(patches, (0, 2, 4, 1, 3, 5))
    x2d = patches.reshape(B * n, F)

    y2d = _projection(x2d, w, b, out_dtype)
    return y2d.reshape(B, n, E)


# ---------------------------------------------------------------------------
# Deterministic parameter init (mimics nn.Linear's U(-1/sqrt(fan_in), ...))
# ---------------------------------------------------------------------------
def init_params(key, in_features, embed_dim):
    kw, kb = jax.random.split(key)
    bound = 1.0 / jnp.sqrt(in_features)
    # Stored as (in_features, embed_dim) so the kernel computes x @ w directly
    # (equivalent to PyTorch's x @ weight.T with weight (embed_dim, in_features)).
    w = jax.random.uniform(kw, (in_features, embed_dim),
                           minval=-bound, maxval=bound, dtype=jnp.float32)
    b = jax.random.uniform(kb, (embed_dim,),
                           minval=-bound, maxval=bound, dtype=jnp.float32)
    return w, b


if __name__ == "__main__":
    # Small config consistent with the module:
    # batch=2, channels=4, H=W=16, patch 8x8 -> num_patches=4, embed_dim=32.
    B, C, H, W = 2, 4, 16, 16
    ph, pw = 8, 8
    embed_dim = 32
    in_features = C * ph * pw

    key = jax.random.PRNGKey(0)
    kx, kp = jax.random.split(key)
    x = jax.random.normal(kx, (B, C, H, W), dtype=jnp.float32)
    w, b = init_params(kp, in_features, embed_dim)

    # Pure-JAX reference of the same math.
    patches_ref = jnp.transpose(
        x.reshape(B, C, H // ph, ph, W // pw, pw), (0, 2, 4, 1, 3, 5)
    ).reshape(B, (H // ph) * (W // pw), in_features)
    ref = jnp.dot(patches_ref, w, precision=jax.lax.Precision.HIGHEST) + b

    # 1) f32 path (strict tolerance).
    fwd = jax.jit(functools.partial(patch_embedding_forward,
                                    patch_height=ph, patch_width=pw))
    out = jax.block_until_ready(fwd(x, w, b))
    assert out.shape == (B, (H // ph) * (W // pw), embed_dim)
    assert jnp.allclose(out, ref, atol=2e-5, rtol=2e-5)

    # 2) bf16 compute path (halved HBM traffic; loose tolerance, f32 accum).
    fwd_bf16 = jax.jit(functools.partial(patch_embedding_forward,
                                         patch_height=ph, patch_width=pw,
                                         compute_dtype=jnp.bfloat16))
    out_bf16 = jax.block_until_ready(fwd_bf16(x, w, b))
    assert out_bf16.shape == out.shape
    assert out_bf16.dtype == x.dtype
    assert jnp.allclose(out_bf16, ref, atol=5e-2, rtol=5e-2)

    print("KERNEL_OK")
</pallas_src>

<mosaic_0001>
module attributes {stable_mosaic.version = 11 : i64} {
  func.func @_proj_kernel(%arg0: i32, %arg1: memref<8x256xf32, #tpu.memory_space<vmem>>, %arg2: memref<256x128xf32, #tpu.memory_space<vmem>>, %arg3: memref<1x128xf32, #tpu.memory_space<vmem>>, %arg4: memref<8x128xf32, #tpu.memory_space<vmem>>) attributes {dimension_semantics = [#tpu.dimension_semantics<parallel>], iteration_bounds = array<i64: 1>, scalar_prefetch = 0 : i64, scratch_operands = 0 : i64, tpu.core_type = #tpu.core_type<tc>, window_params = [{transform_indices = @transform_0, window_bounds = array<i64: 8, 256>}, {pipeline_mode = #tpu.pipeline_mode<synchronous>, transform_indices = @transform_1, window_bounds = array<i64: 256, 128>}, {pipeline_mode = #tpu.pipeline_mode<synchronous>, transform_indices = @transform_2, window_bounds = array<i64: 1, 128>}, {transform_indices = @transform_3, window_bounds = array<i64: 8, 128>}]} {
    %c0 = arith.constant 0 : index
    %c0_0 = arith.constant 0 : index
    %0 = vector.load %arg1[%c0, %c0_0] : memref<8x256xf32, #tpu.memory_space<vmem>>, vector<8x256xf32>
    %c0_1 = arith.constant 0 : index
    %c0_2 = arith.constant 0 : index
    %1 = vector.load %arg2[%c0_1, %c0_2] : memref<256x128xf32, #tpu.memory_space<vmem>>, vector<256x128xf32>
    %cst = arith.constant dense<0.000000e+00> : vector<8x128xf32>
    %2 = tpu.matmul %0, %1, %cst {dimension_numbers = #tpu.dot_dimension_numbers<[1], [0], [0], [1], [0, 0, 1, 1], [], []>} : vector<8x256xf32>, vector<256x128xf32>, vector<8x128xf32> -> vector<8x128xf32>
    %c0_3 = arith.constant 0 : index
    %c0_4 = arith.constant 0 : index
    %3 = vector.load %arg3[%c0_3, %c0_4] : memref<1x128xf32, #tpu.memory_space<vmem>>, vector<1x128xf32>
    %4 = vector.broadcast %3 : vector<1x128xf32> to vector<8x128xf32>
    %5 = arith.addf %2, %4 : vector<8x128xf32>
    %c0_5 = arith.constant 0 : index
    %c0_6 = arith.constant 0 : index
    %6 = vector.load %arg4[%c0_5, %c0_6] : memref<8x128xf32, #tpu.memory_space<vmem>>, vector<8x128xf32>
    tpu.vector_store %arg4[%c0_5, %c0_6], %5 {strides = array<i32>} : memref<8x128xf32, #tpu.memory_space<vmem>>, vector<8x128xf32>,
    return
  }
  func.func @transform_0(%arg0: i32) -> (i32, i32) {
    %c0_i32 = arith.constant 0 : i32
    %c0_i32_0 = arith.constant 0 : i32
    return %arg0, %c0_i32 : i32, i32
  }
  func.func @transform_1(%arg0: i32) -> (i32, i32) {
    %c0_i32 = arith.constant 0 : i32
    %c0_i32_0 = arith.constant 0 : i32
    %c0_i32_1 = arith.constant 0 : i32
    return %c0_i32, %c0_i32_0 : i32, i32
  }
  func.func @transform_2(%arg0: i32) -> (i32, i32) {
    %c0_i32 = arith.constant 0 : i32
    %c0_i32_0 = arith.constant 0 : i32
    %c0_i32_1 = arith.constant 0 : i32
    return %c0_i32, %c0_i32_0 : i32, i32
  }
  func.func @transform_3(%arg0: i32) -> (i32, i32) {
    %c0_i32 = arith.constant 0 : i32
    %c0_i32_0 = arith.constant 0 : i32
    return %arg0, %c0_i32 : i32, i32
  }
}

</mosaic_0001>

<bundles_post_ra>
// kernel: patch_embedding_forward.1
= control target key start
LH: loop header
LB: loop body
LE: loop exit
PB: predicated region body
PF: predicated region fallthrough
CT: control target
= control target key end

     0   :  { %s372_s0 = inlined_call_operand.vmem [shape: f32[8,256], index: 0, kind: input, shape index: {}]   ;;  %s373_s1 = inlined_call_operand.vmem [shape: f32[256,128], index: 1, kind: input, shape index: {}]   ;;  %s374_s2 = inlined_call_operand.vmem [shape: f32[1,128], index: 2, kind: input, shape index: {}]   ;;  %s375_s3 = inlined_call_operand.hbm [shape: f32[8,128], index: 3, kind: output, shape index: {}]  }
   0x1   :  { %v33_v0 = vld [vmem:[%s373_s1 + $0x80] sm:$0xff]  ;;  %v34_v1 = vld [vmem:[%s373_s1 + $0x88] sm:$0xff]  ;;  %v35_v5 = vld [vmem:[%s373_s1 + $0x90] sm:$0xff] }
   0x2   :  { %v17_v2 = vld [vmem:[%s373_s1] sm:$0xff]  ;;  %v177_v3 = vpack.c.bf16 %v34_v1, %v33_v0  ;;  %v18_v4 = vld [vmem:[%s373_s1 + $0x8] sm:$0xff]  ;;  %v36_v6 = vld [vmem:[%s373_s1 + $0x98] sm:$0xff] }
   0x3   :  { %v179_v7 = vpack.c.bf16 %v18_v4, %v17_v2  ;;  %v181_v8 = vpack.c.bf16 %v36_v6, %v35_v5  ;;  %v19_v9 = vld [vmem:[%s373_s1 + $0x10] sm:$0xff]  ;;  %v20_v10 = vld [vmem:[%s373_s1 + $0x18] sm:$0xff]  ;;  %v37_v11 = vld [vmem:[%s373_s1 + $0xa0] sm:$0xff] }
   0x4   :  { %178 = vmatprep.subr.bf16.mxu0 %v177_v3  ;;  %v38_v12 = vld [vmem:[%s373_s1 + $0xa8] sm:$0xff]  ;;  %v183_v13 = vpack.c.bf16 %v20_v10, %v19_v9  ;;  %v21_v15 = vld [vmem:[%s373_s1 + $0x20] sm:$0xff]  ;;  %v39_v17 = vld [vmem:[%s373_s1 + $0xb0] sm:$0xff] }
   0x5   :  { %180 = vmatpush3.bf16.msra.mxu0 %v179_v7  ;;  %v185_v14 = vpack.c.bf16 %v38_v12, %v37_v11  ;;  %v22_v16 = vld [vmem:[%s373_s1 + $0x28] sm:$0xff]  ;;  %v40_v18 = vld [vmem:[%s373_s1 + $0xb8] sm:$0xff]  ;;  %v23_v21 = vld [vmem:[%s373_s1 + $0x30] sm:$0xff] }
   0x6   :  { %182 = vmatprep.subr.bf16.mxu0 %v181_v8  ;;  %v187_v19 = vpack.c.bf16 %v22_v16, %v21_v15  ;;  %v189_v20 = vpack.c.bf16 %v40_v18, %v39_v17  ;;  %v24_v22 = vld [vmem:[%s373_s1 + $0x38] sm:$0xff]  ;;  %v41_v23 = vld [vmem:[%s373_s1 + $0xc0] sm:$0xff]  ;;  %v42_v24 = vld [vmem:[%s373_s1 + $0xc8] sm:$0xff] }
   0x7   :  { %v16_v25 = vld [vmem:[%s372_s0 + $0x8] sm:$0xff] }
   0x8   :  { %120 = vmatprep.mubr.f32.mxu0 %v16_v25 }
   0x9   :  { %184 = vmatpush3.bf16.msra.mxu0 %v183_v13 }
   0xa   :  { %186 = vmatprep.subr.bf16.mxu0 %v185_v14 }
   0xb   :  { %8 = vsyncpa [#allocation3], 0  ;;  %v191_v26 = vpack.c.bf16 %v24_v22, %v23_v21  ;;  %v193_v27 = vpack.c.bf16 %v42_v24, %v41_v23  ;;  %v25_v28 = vld [vmem:[%s373_s1 + $0x40] sm:$0xff]  ;;  %v26_v29 = vld [vmem:[%s373_s1 + $0x48] sm:$0xff]  ;;  %s234_s28 = smov [#allocation2]  }
   0xc   :  { %v43_v30 = vld [vmem:[%s373_s1 + $0xd0] sm:$0xff]  ;;  %v44_v31 = vld [vmem:[%s373_s1 + $0xd8] sm:$0xff]  ;;  %v195_v32 = vpack.c.bf16 %v26_v29, %v25_v28  ;;  %v45_v36 = vld [vmem:[%s373_s1 + $0xe0] sm:$0xff]  ;;  %s133_s29 = sshll.u32 %s234_s28, 4  ;;  %s134_s29 = int_to_ptr.vmem [resolvable:$true] %s133_s29 }
   0xd   :  { %188 = vmatpush3.bf16.msra.mxu0 %v187_v19  ;;  %v197_v33 = vpack.c.bf16 %v44_v31, %v43_v30  ;;  %v27_v34 = vld [vmem:[%s373_s1 + $0x50] sm:$0xff]  ;;  %v28_v35 = vld [vmem:[%s373_s1 + $0x58] sm:$0xff]  ;;  %v46_v37 = vld [vmem:[%s373_s1 + $0xe8] sm:$0xff]  ;;  %p215_p1 = scmp.lt.s32.totalorder %s134_s29, %s134_s29 }
   0xe   :  { %190 = vmatprep.subr.bf16.mxu0 %v189_v20  ;;  %v199_v38 = vpack.c.bf16 %v28_v35, %v27_v34  ;;  %v201_v39 = vpack.c.bf16 %v46_v37, %v45_v36  ;;  %v29_v40 = vld [vmem:[%s373_s1 + $0x60] sm:$0xff]  ;;  %v30_v41 = vld [vmem:[%s373_s1 + $0x68] sm:$0xff]  ;;  %v47_v42 = vld [vmem:[%s373_s1 + $0xf0] sm:$0xff] }
   0xf   :  { %v48_v43 = vld [vmem:[%s373_s1 + $0xf8] sm:$0xff]  ;;  %v203_v44 = vpack.c.bf16 %v30_v41, %v29_v40  ;;  %v31_v46 = vld [vmem:[%s373_s1 + $0x70] sm:$0xff]  ;;  %v15_v49 = vld [vmem:[%s372_s0] sm:$0xff] }
  0x10   :  { %v205_v45 = vpack.c.bf16 %v48_v43, %v47_v42  ;;  %v32_v47 = vld [vmem:[%s373_s1 + $0x78] sm:$0xff]  ;;  %v141_v52 = vld [vmem:[%s374_s2] ss:$0 sm:$0xff]  ;;  %s210_s1 = scalar_lea.vmem %s134_s29, 128 }
  0x11   :  { %192 = vmatpush3.bf16.msra.mxu0 %v191_v26  ;;  %v207_v48 = vpack.c.bf16 %v32_v47, %v31_v46  ;;  %p211_p0 = scmp.ne.s32.totalorder %s134_s29, %s210_s1  ;;  %p216_p2 = scmp.lt.s32.totalorder %s210_s1, %s210_s1 }
  0x12   :  { %194 = vmatprep.subr.bf16.mxu0 %v193_v27 }
  0x13   :  { %p217_p3 = por %p216_p2, %p215_p1 }
  0x15   :  { %196 = vmatpush3.bf16.msra.mxu0 %v195_v32  ;;  %p218_p4 = pnand %p217_p3, %p211_p0 }
  0x16   :  { %198 = vmatprep.subr.bf16.mxu0 %v197_v33 }
  0x19   :  { %200 = vmatpush3.bf16.msra.mxu0 %v199_v38 }
  0x1a   :  { %202 = vmatprep.subr.bf16.mxu0 %v201_v39 }
  0x1d   :  { %204 = vmatpush3.bf16.msra.mxu0 %v203_v44 }
  0x1e   :  { %206 = vmatprep.subr.bf16.mxu0 %v205_v45 }
  0x21   :  { %208 = vmatpush3.bf16.msra.mxu0 %v207_v48 }
  0x24   :  { %121 = vmatmul.mubr.f32.vlgmr.msra.gmra.mrb[0].mxu0 %v15_v49 }
  0xf7   :  { %v174_v50 = vpop.f32.mrb[0].mxu0 }
  0xf8   :  { %v175_v51 = vpop.f32.mrb[1].mxu0 }
  0xf9   :  { %v176_v53 = vadd.f32 %v175_v51, %v174_v50 }
  0xfb   :  { %v123_v54 = vadd.f32 %v176_v53, %v141_v52 }
  0xfd   :  { %126 = vst [vmem:[#allocation2] sm:$0xff] %v123_v54 }
  0xfe   :  { %221 = shalt.err (!%p218_p4)
}
  0xff   :  { %s222_s4 = scalar_lea.hbm %s375_s3, 128 }
 0x100   :  { %p223_p5 = scmp.ne.s32.totalorder %s375_s3, %s222_s4  ;;  %p226_p6 = scmp.lt.u32.totalorder %s222_s4, %s375_s3 }
 0x102   :  { %p228_p7 = pnand %p226_p6, %p223_p5 }
 0x104   :  { %231 = shalt.err (!%p228_p7)
}
 0x105   :  { %136 = dma.vmem_to_hbm [thread:$0]  %s134_s29, 128, %s375_s3, [#allocation3]  }
 0x106   :  { %232 = dma.done.wait [#allocation3], 128  }
 0x107   :  { %233 = vsyncadd [#allocation3], 4294967168 }
 0x108   :  { %140 = vsyncpa [#allocation3], 1 }

</bundles_post_ra>
